<compile_context>
chip_gen: v6e
topology: v6e:2x2x1
jax: 0.10.0
libtpu: 0.0.40
codegen_flags: <defaults>
</compile_context>

<pallas_src>
import functools

import jax
import jax.numpy as jnp
from jax.experimental import pallas as pl
from jax.experimental.pallas import tpu as pltpu


def _round_up(n, m):
    return ((n + m - 1) // m) * m


# --------------------------------------------------------------------------
# Kernel: 3 lane-dense MXU matmuls, bias+ReLU on full 128-lane vregs.
# --------------------------------------------------------------------------
def drc_kernel(x_ref, wfc_ref, wbd_ref, wcls_ref, bias_ref, o_ref, *, hpad, npad):
    wdt = wfc_ref.dtype
    x = x_ref[...].astype(wdt)                                   # (TM, C)

    b_fc = bias_ref[0:1, 0:hpad]                                 # (1, Hpad) f32
    b_bd = bias_ref[1:2, 0:hpad]                                 # (1, Hpad) f32
    b_cls = bias_ref[2:3, 0:npad]                                # (1, Npad) f32

    # h = relu(x @ Wfc + bfc)   — single (TM, Hpad) lane-dense tile.
    h = jnp.maximum(
        jnp.dot(x, wfc_ref[...], preferred_element_type=jnp.float32) + b_fc, 0.0)

    # o = relu(h @ blockdiag(W1, W2, W3) + [b1|b2|b3])
    o = jnp.maximum(
        jnp.dot(h.astype(wdt), wbd_ref[...], preferred_element_type=jnp.float32) + b_bd,
        0.0)

    # logits = o @ Wcls + bcls  — one dense (TM, Npad) store.
    o_ref[...] = (
        jnp.dot(o.astype(wdt), wcls_ref[...], preferred_element_type=jnp.float32) + b_cls
    ).astype(o_ref.dtype)


# --------------------------------------------------------------------------
# One-time parameter preparation (hoisted out of the per-call hot path).
# --------------------------------------------------------------------------
def prepare_params(params, *, weight_dtype=jnp.float32):
    """Fuse / pad the PyTorch-style weights into 4 lane-dense kernel operands.

    `weight_dtype=jnp.bfloat16` is an optional v6e/v7x MXU optimization
    (accumulation stays f32; biases / elementwise stay f32).
    """
    C = params["w1"].shape[0]
    n1 = params["wc1"].shape[1]
    n2 = params["wc2"].shape[1]
    n3 = params["wc3"].shape[1]
    n_total = n1 + n2 + n3
    H = 3 * C
    hpad = _round_up(H, 128)
    npad = _round_up(n_total, 128)
    lmax = max(hpad, npad)

    # fc: (C, 3C) -> (C, Hpad)
    wfc = jnp.zeros((C, hpad), jnp.float32).at[:, :H].set(params["wfc"])

    # block-diag(W1, W2, W3): (3C, 3C) -> (Hpad, Hpad)
    wbd = (jnp.zeros((hpad, hpad), jnp.float32)
           .at[0:C, 0:C].set(params["w1"])
           .at[C:2 * C, C:2 * C].set(params["w2"])
           .at[2 * C:3 * C, 2 * C:3 * C].set(params["w3"]))

    # fused classifier: rows index [o1|o2|o3], cols [cls1|cls2|cls3]
    wcls = (jnp.zeros((hpad, npad), jnp.float32)
            .at[0:3 * C, 0:n1].set(params["wc1"])
            .at[C:3 * C, n1:n1 + n2].set(params["wc2"])
            .at[2 * C:3 * C, n1 + n2:n_total].set(params["wc3"]))

    # stacked biases (f32): row 0 = bfc, row 1 = [b1|b2|b3], row 2 = [bc1|bc2|bc3]
    biases = (jnp.zeros((3, lmax), jnp.float32)
              .at[0, 0:H].set(params["bfc"][0])
              .at[1, 0:C].set(params["b1"][0])
              .at[1, C:2 * C].set(params["b2"][0])
              .at[1, 2 * C:3 * C].set(params["b3"][0])
              .at[2, 0:n1].set(params["bc1"][0])
              .at[2, n1:n1 + n2].set(params["bc2"][0])
              .at[2, n1 + n2:n_total].set(params["bc3"][0]))

    return dict(
        wfc=wfc.astype(weight_dtype),
        wbd=wbd.astype(weight_dtype),
        wcls=wcls.astype(weight_dtype),
        biases=biases,
        C=C, hpad=hpad, npad=npad, n_total=n_total,
    )


def _choose_tm(B, block_rows):
    """Pick a batch-tile size: >=2 grid steps when possible (v7x megacore),
    large tiles (default up to 1024 rows) to amortize per-step overhead."""
    b8 = _round_up(max(B, 1), 8)
    if b8 < 16:
        return b8
    half = _round_up((b8 + 1) // 2, 8)
    return max(8, min(_round_up(block_rows, 8), half))


# --------------------------------------------------------------------------
# Per-call wrapper: pad batch -> pallas_call -> slice. Jit at the call site.
# --------------------------------------------------------------------------
def drc_forward(x, prep, *, block_rows=1024, trim=True):
    """x: (B, C) float32. prep: output of prepare_params()."""
    B, C = x.shape
    hpad, npad, n_total = prep["hpad"], prep["npad"], prep["n_total"]
    lmax = prep["biases"].shape[1]

    TM = _choose_tm(B, block_rows)
    B_pad = _round_up(B, TM)
    if B_pad != B:
        x = jnp.pad(x, ((0, B_pad - B), (0, 0)))
    grid = (B_pad // TM,)

    wbytes = jnp.dtype(prep["wfc"].dtype).itemsize
    flops = 2 * B_pad * (C * hpad + hpad * hpad + hpad * npad)
    bytes_accessed = (
        4 * (B_pad * C + 3 * lmax + B_pad * npad)
        + wbytes * (C * hpad + hpad * hpad + hpad * npad)
    )

    kernel = functools.partial(drc_kernel, hpad=hpad, npad=npad)

    out = pl.pallas_call(
        kernel,
        out_shape=jax.ShapeDtypeStruct((B_pad, npad), jnp.float32),
        grid=grid,
        in_specs=[
            pl.BlockSpec((TM, C), lambda i: (i, 0)),          # x: batch-tiled
            pl.BlockSpec((C, hpad), lambda i: (0, 0)),        # Wfc: resident
            pl.BlockSpec((hpad, hpad), lambda i: (0, 0)),     # Wbd: resident
            pl.BlockSpec((hpad, npad), lambda i: (0, 0)),     # Wcls: resident
            pl.BlockSpec((3, lmax), lambda i: (0, 0)),        # biases: resident
        ],
        out_specs=pl.BlockSpec((TM, npad), lambda i: (i, 0)),
        compiler_params=pltpu.CompilerParams(
            dimension_semantics=("parallel",)),
        cost_estimate=pl.CostEstimate(
            flops=flops, transcendentals=0, bytes_accessed=bytes_accessed),
    )(x, prep["wfc"], prep["wbd"], prep["wcls"], prep["biases"])

    if trim:
        return out[:B, :n_total]
    return out   # (B_pad, Npad) lane-padded logits (consumer may slice lazily)


# --------------------------------------------------------------------------
# Init + pure-JAX reference (for correctness check).
# --------------------------------------------------------------------------
def init_params(key, in_channels, num_classes1=12, num_classes2=24, num_classes3=48):
    """Deterministic init mimicking nn.Linear's U(-1/sqrt(fan_in), 1/sqrt(fan_in)).
    Weights stored pre-transposed as (in, out); biases as (1, out)."""
    C = in_channels

    def linear(k, fan_in, fan_out):
        kw, kb = jax.random.split(k)
        bound = 1.0 / jnp.sqrt(fan_in)
        w = jax.random.uniform(kw, (fan_in, fan_out), jnp.float32, -bound, bound)
        b = jax.random.uniform(kb, (1, fan_out), jnp.float32, -bound, bound)
        return w, b

    ks = jax.random.split(key, 7)
    wfc, bfc = linear(ks[0], C, 3 * C)
    w1, b1 = linear(ks[1], C, C)
    w2, b2 = linear(ks[2], C, C)
    w3, b3 = linear(ks[3], C, C)
    wc1, bc1 = linear(ks[4], 3 * C, num_classes1)
    wc2, bc2 = linear(ks[5], 2 * C, num_classes2)
    wc3, bc3 = linear(ks[6], C, num_classes3)
    return dict(
        wfc=wfc, bfc=bfc,
        w1=w1, b1=b1, w2=w2, b2=b2, w3=w3, b3=b3,
        wc1=wc1, bc1=bc1, wc2=wc2, bc2=bc2, wc3=wc3, bc3=bc3,
    )


def drc_reference(x, p):
    C = x.shape[1]
    h = jax.nn.relu(x @ p["wfc"] + p["bfc"])
    out1 = jax.nn.relu(h[:, :C] @ p["w1"] + p["b1"])
    out2 = jax.nn.relu(h[:, C:2 * C] @ p["w2"] + p["b2"])
    out3 = jax.nn.relu(h[:, 2 * C:] @ p["w3"] + p["b3"])
    l1 = jnp.concatenate([out1, out2, out3], axis=1) @ p["wc1"] + p["bc1"]
    l2 = jnp.concatenate([out2, out3], axis=1) @ p["wc2"] + p["bc2"]
    l3 = out3 @ p["wc3"] + p["bc3"]
    return jnp.concatenate([l1, l2, l3], axis=1)


if __name__ == "__main__":
    key = jax.random.PRNGKey(0)
    kx, kp = jax.random.split(key)

    B, C = 8, 32                          # batch=8, in_channels=32
    x = jax.random.normal(kx, (B, C), jnp.float32)
    params = init_params(kp, C)

    # One-time prep (fused/padded weights), then jit the lean per-call wrapper.
    prep = prepare_params(params)                    # f32 weights (exact match)
    fwd = jax.jit(lambda v: drc_forward(v, prep))

    logits = jax.block_until_ready(fwd(x))
    ref = drc_reference(x, params)
    assert logits.shape == (B, 12 + 24 + 48)
    assert jnp.allclose(logits, ref, atol=1e-4, rtol=1e-4)

    # Batch-padding path (B not a multiple of 8).
    xb = jax.random.normal(kx, (5, C), jnp.float32)
    lb = jax.block_until_ready(jax.jit(lambda v: drc_forward(v, prep))(xb))
    assert lb.shape == (5, 84)
    assert jnp.allclose(lb, drc_reference(xb, params), atol=1e-4, rtol=1e-4)

    # Multi-step grid path (>=2 tiles -> both TensorCores on v7x).
    xc = jax.random.normal(kx, (40, C), jnp.float32)
    lc = jax.block_until_ready(jax.jit(lambda v: drc_forward(v, prep))(xc))
    assert lc.shape == (40, 84)
    assert jnp.allclose(lc, drc_reference(xc, params), atol=1e-4, rtol=1e-4)

    print("KERNEL_OK")
</pallas_src>

<mosaic_0001>
module attributes {stable_mosaic.version = 11 : i64} {
  func.func @drc_kernel(%arg0: i32, %arg1: memref<8x32xf32, #tpu.memory_space<vmem>>, %arg2: memref<32x128xf32, #tpu.memory_space<vmem>>, %arg3: memref<128x128xf32, #tpu.memory_space<vmem>>, %arg4: memref<128x128xf32, #tpu.memory_space<vmem>>, %arg5: memref<3x128xf32, #tpu.memory_space<vmem>>, %arg6: memref<8x128xf32, #tpu.memory_space<vmem>>) attributes {dimension_semantics = [#tpu.dimension_semantics<parallel>], iteration_bounds = array<i64: 1>, scalar_prefetch = 0 : i64, scratch_operands = 0 : i64, tpu.core_type = #tpu.core_type<tc>, window_params = [{transform_indices = @transform_0, window_bounds = array<i64: 8, 32>}, {pipeline_mode = #tpu.pipeline_mode<synchronous>, transform_indices = @transform_1, window_bounds = array<i64: 32, 128>}, {pipeline_mode = #tpu.pipeline_mode<synchronous>, transform_indices = @transform_2, window_bounds = array<i64: 128, 128>}, {pipeline_mode = #tpu.pipeline_mode<synchronous>, transform_indices = @transform_3, window_bounds = array<i64: 128, 128>}, {pipeline_mode = #tpu.pipeline_mode<synchronous>, transform_indices = @transform_4, window_bounds = array<i64: 3, 128>}, {transform_indices = @transform_5, window_bounds = array<i64: 8, 128>}]} {
    %c0 = arith.constant 0 : index
    %c0_0 = arith.constant 0 : index
    %0 = vector.load %arg1[%c0, %c0_0] : memref<8x32xf32, #tpu.memory_space<vmem>>, vector<8x32xf32>
    %c0_1 = arith.constant 0 : index
    %c0_2 = arith.constant 0 : index
    %1 = vector.load %arg5[%c0_1, %c0_2] : memref<3x128xf32, #tpu.memory_space<vmem>>, vector<1x128xf32>
    %c1 = arith.constant 1 : index
    %c0_3 = arith.constant 0 : index
    %2 = vector.load %arg5[%c1, %c0_3] : memref<3x128xf32, #tpu.memory_space<vmem>>, vector<1x128xf32>
    %c2 = arith.constant 2 : index
    %c0_4 = arith.constant 0 : index
    %3 = vector.load %arg5[%c2, %c0_4] : memref<3x128xf32, #tpu.memory_space<vmem>>, vector<1x128xf32>
    %c0_5 = arith.constant 0 : index
    %c0_6 = arith.constant 0 : index
    %4 = vector.load %arg2[%c0_5, %c0_6] : memref<32x128xf32, #tpu.memory_space<vmem>>, vector<32x128xf32>
    %cst = arith.constant dense<0.000000e+00> : vector<8x128xf32>
    %5 = tpu.matmul %0, %4, %cst {dimension_numbers = #tpu.dot_dimension_numbers<[1], [0], [0], [1], [0, 0, 1, 1], [], []>} : vector<8x32xf32>, vector<32x128xf32>, vector<8x128xf32> -> vector<8x128xf32>
    %6 = vector.broadcast %1 : vector<1x128xf32> to vector<8x128xf32>
    %7 = arith.addf %5, %6 : vector<8x128xf32>
    %cst_7 = arith.constant 0.000000e+00 : f32
    %8 = vector.broadcast %cst_7 : f32 to vector<8x128xf32>
    %9 = arith.maximumf %7, %8 : vector<8x128xf32>
    %c0_8 = arith.constant 0 : index
    %c0_9 = arith.constant 0 : index
    %10 = vector.load %arg3[%c0_8, %c0_9] : memref<128x128xf32, #tpu.memory_space<vmem>>, vector<128x128xf32>
    %cst_10 = arith.constant dense<0.000000e+00> : vector<8x128xf32>
    %11 = tpu.matmul %9, %10, %cst_10 {dimension_numbers = #tpu.dot_dimension_numbers<[1], [0], [0], [1], [0, 0, 1, 1], [], []>} : vector<8x128xf32>, vector<128x128xf32>, vector<8x128xf32> -> vector<8x128xf32>
    %12 = vector.broadcast %2 : vector<1x128xf32> to vector<8x128xf32>
    %13 = arith.addf %11, %12 : vector<8x128xf32>
    %cst_11 = arith.constant 0.000000e+00 : f32
    %14 = vector.broadcast %cst_11 : f32 to vector<8x128xf32>
    %15 = arith.maximumf %13, %14 : vector<8x128xf32>
    %c0_12 = arith.constant 0 : index
    %c0_13 = arith.constant 0 : index
    %16 = vector.load %arg4[%c0_12, %c0_13] : memref<128x128xf32, #tpu.memory_space<vmem>>, vector<128x128xf32>
    %cst_14 = arith.constant dense<0.000000e+00> : vector<8x128xf32>
    %17 = tpu.matmul %15, %16, %cst_14 {dimension_numbers = #tpu.dot_dimension_numbers<[1], [0], [0], [1], [0, 0, 1, 1], [], []>} : vector<8x128xf32>, vector<128x128xf32>, vector<8x128xf32> -> vector<8x128xf32>
    %18 = vector.broadcast %3 : vector<1x128xf32> to vector<8x128xf32>
    %19 = arith.addf %17, %18 : vector<8x128xf32>
    %c0_15 = arith.constant 0 : index
    %c0_16 = arith.constant 0 : index
    %20 = vector.load %arg6[%c0_15, %c0_16] : memref<8x128xf32, #tpu.memory_space<vmem>>, vector<8x128xf32>
    tpu.vector_store %arg6[%c0_15, %c0_16], %19 {strides = array<i32>} : memref<8x128xf32, #tpu.memory_space<vmem>>, vector<8x128xf32>,
    return
  }
  func.func @transform_0(%arg0: i32) -> (i32, i32) {
    %c0_i32 = arith.constant 0 : i32
    %c0_i32_0 = arith.constant 0 : i32
    return %arg0, %c0_i32 : i32, i32
  }
  func.func @transform_1(%arg0: i32) -> (i32, i32) {
    %c0_i32 = arith.constant 0 : i32
    %c0_i32_0 = arith.constant 0 : i32
    %c0_i32_1 = arith.constant 0 : i32
    return %c0_i32, %c0_i32_0 : i32, i32
  }
  func.func @transform_2(%arg0: i32) -> (i32, i32) {
    %c0_i32 = arith.constant 0 : i32
    %c0_i32_0 = arith.constant 0 : i32
    %c0_i32_1 = arith.constant 0 : i32
    return %c0_i32, %c0_i32_0 : i32, i32
  }
  func.func @transform_3(%arg0: i32) -> (i32, i32) {
    %c0_i32 = arith.constant 0 : i32
    %c0_i32_0 = arith.constant 0 : i32
    %c0_i32_1 = arith.constant 0 : i32
    return %c0_i32, %c0_i32_0 : i32, i32
  }
  func.func @transform_4(%arg0: i32) -> (i32, i32) {
    %c0_i32 = arith.constant 0 : i32
    %c0_i32_0 = arith.constant 0 : i32
    %c0_i32_1 = arith.constant 0 : i32
    return %c0_i32, %c0_i32_0 : i32, i32
  }
  func.func @transform_5(%arg0: i32) -> (i32, i32) {
    %c0_i32 = arith.constant 0 : i32
    %c0_i32_0 = arith.constant 0 : i32
    return %arg0, %c0_i32 : i32, i32
  }
}

</mosaic_0001>

<bundles_post_ra>
// kernel: _lambda_.1
= control target key start
LH: loop header
LB: loop body
LE: loop exit
PB: predicated region body
PF: predicated region fallthrough
CT: control target
= control target key end

     0   :  { %10 = vsyncpa [#allocation3], 0  ;;  %s715_s0 = inlined_call_operand.hbm [shape: f32[8,32], index: 0, kind: input, shape index: {}]   ;;  %s716_s1 = inlined_call_operand.hbm [shape: f32[32,128], index: 1, kind: input, shape index: {}]   ;;  %s717_s2 = inlined_call_operand.hbm [shape: f32[128,128], index: 2, kind: input, shape index: {}]   ;;  %s718_s3 = inlined_call_operand.hbm [shape: f32[128,128], index: 3, kind: input, shape index: {}]   ;;  %s719_s4 = inlined_call_operand.vmem [shape: f32[3,128], index: 4, kind: input, shape index: {}]   ;;  %s720_s5 = inlined_call_operand.hbm [shape: f32[8,128], index: 5, kind: output, shape index: {}]  }
   0x1   :  { %11 = vsyncpa [#allocation6], 0 }
   0x2   :  { %12 = vsyncpa [#allocation9], 0 }
   0x3   :  { %13 = vsyncpa [#allocation4], 0  ;;  %s601_s18 = smov [#allocation5]  }
   0x4   :  { %s29_s19 = sshll.u32 %s601_s18, 4  ;;  %s30_s19 = int_to_ptr.vmem [resolvable:$true] %s29_s19 }
   0x5   :  { %s501_s20 = scalar_lea.vmem %s30_s19, 512  ;;  %p506_p1 = scmp.lt.s32.totalorder %s30_s19, %s30_s19 }
   0x6   :  { %p502_p0 = scmp.ne.s32.totalorder %s30_s19, %s501_s20  ;;  %p507_p2 = scmp.lt.s32.totalorder %s501_s20, %s501_s20 }
   0x8   :  { %p508_p3 = por %p507_p2, %p506_p1 }
   0xa   :  { %p509_p4 = pnand %p508_p3, %p502_p0 }
   0xc   :  { %512 = shalt.err (!%p509_p4)
}
   0xd   :  { %s602_s21 = smov 128   ;;  %s603_s22 = smov 8  }
   0xe   :  { %35 = dma.hbm_to_vmem [thread:$0]  %s716_s1, 512, %s30_s19, [#allocation6], %s602_s21, %s602_s21, %s603_s22  }
   0xf   :  { %s604_s25 = smov [#allocation2]   ;;  %s605_s27 = smov [#allocation7]  }
  0x10   :  { %s20_s26 = sshll.u32 %s604_s25, 4  ;;  %s41_s28 = sshll.u32 %s605_s27, 4  ;;  %s21_s26 = int_to_ptr.vmem [resolvable:$true] %s20_s26  ;;  %s42_s28 = int_to_ptr.vmem [resolvable:$true] %s41_s28 }
  0x11   :  { %s521_s29 = scalar_lea.vmem %s21_s26, 128  ;;  %p526_p6 = scmp.lt.s32.totalorder %s21_s26, %s21_s26 }
  0x12   :  { %p522_p5 = scmp.ne.s32.totalorder %s21_s26, %s521_s29  ;;  %p527_p7 = scmp.lt.s32.totalorder %s521_s29, %s521_s29 }
  0x14   :  { %p528_p8 = por %p527_p7, %p526_p6 }
  0x16   :  { %p529_p9 = pnand %p528_p8, %p522_p5 }
  0x18   :  { %532 = shalt.err (!%p529_p9)
}
  0x19   :  { %23 = dma.hbm_to_vmem [thread:$0]  %s715_s0, 128, %s21_s26, [#allocation3]  }
  0x1a   :  { %s541_s7 = scalar_lea.vmem %s42_s28, 2048  ;;  %p546_p11 = scmp.lt.s32.totalorder %s42_s28, %s42_s28 }
  0x1b   :  { %p542_p10 = scmp.ne.s32.totalorder %s42_s28, %s541_s7  ;;  %p547_p12 = scmp.lt.s32.totalorder %s541_s7, %s541_s7 }
  0x1d   :  { %p548_p13 = por %p547_p12, %p546_p11 }
  0x1f   :  { %p549_p0 = pnand %p548_p13, %p542_p10 }
  0x21   :  { %552 = shalt.err (!%p549_p0)
}
  0x22   :  { %47 = dma.hbm_to_vmem [thread:$0]  %s717_s2, 2048, %s42_s28, [#allocation6], %s602_s21, %s602_s21, %s603_s22  }
  0x23   :  { %s606_s9 = smov [#allocation8]  }
  0x24   :  { %s53_s10 = sshll.u32 %s606_s9, 4  ;;  %s54_s10 = int_to_ptr.vmem [resolvable:$true] %s53_s10 }
  0x25   :  { %s561_s11 = scalar_lea.vmem %s54_s10, 2048  ;;  %p566_p2 = scmp.lt.s32.totalorder %s54_s10, %s54_s10 }
  0x26   :  { %p562_p1 = scmp.ne.s32.totalorder %s54_s10, %s561_s11  ;;  %p567_p3 = scmp.lt.s32.totalorder %s561_s11, %s561_s11 }
  0x28   :  { %p568_p4 = por %p567_p3, %p566_p2 }
  0x2a   :  { %p569_p5 = pnand %p568_p4, %p562_p1 }
  0x2c   :  { %572 = shalt.err (!%p569_p5)
}
  0x2d   :  { %59 = dma.hbm_to_vmem [thread:$0]  %s718_s3, 2048, %s54_s10, [#allocation9], %s602_s21, %s602_s21, %s603_s22  }
  0x2e   :  { %593 = dma.done.wait [#allocation3], 128  }
  0x2f   :  { %594 = vsyncadd [#allocation3], 4294967168 }
  0x30   :  { %595 = dma.done.wait [#allocation6], 2560  }
  0x31   :  { %596 = vsyncadd [#allocation6], 4294964736 }
  0x32   :  { %597 = dma.done.wait [#allocation9], 2048  }
  0x33   :  { %598 = vsyncadd [#allocation9], 4294965248  ;;  %v607_v0 = vmov 0.0   ;;  %vm608_vm0 = vmmov 0   ;;  %v81_v1 = vld [vmem:[#allocation5 + $0x18] sm:$0xff]  ;;  %v80_v2 = vld [vmem:[#allocation5 + $0x10] sm:$0xff] }
  0x34   :  { %403 = vmatprep.subr.mxu0 %v607_v0  ;;  %411 = vmatprep.mubr.msk.f32.mxu0 %vm608_vm0, %v607_v0  ;;  %v176_v3 = vld [vmem:[#allocation7 + $0x78] sm:$0xff]  ;;  %v79_v4 = vld [vmem:[#allocation5 + $0x8] sm:$0xff]  ;;  %v175_v5 = vld [vmem:[#allocation7 + $0x70] sm:$0xff]  ;;  %vm86_vm1 = vcmask 261120   ;;  %s609_s17 = smov [#allocation10]  }
  0x35   :  { %414 = vmatprep.subr.mxu1 %v607_v0  ;;  %446 = vmatprep.mubr.msk.f32.mxu1 %vm608_vm0, %v607_v0  ;;  %v174_v6 = vld [vmem:[#allocation7 + $0x68] sm:$0xff]  ;;  %v78_v7 = vld [vmem:[#allocation5] sm:$0xff]  ;;  %v74_v8 = vld [vmem:[#allocation2] sm:$0xff]  ;;  %s349_s18 = sshll.u32 %s609_s17, 4  ;;  %s350_s18 = int_to_ptr.vmem [resolvable:$true] %s349_s18 }
  0x36   :  { %404 = vmatpush3.msra.mxu0 %v81_v1  ;;  %415 = vmatpush3.msra.mxu1 %v176_v3  ;;  %v173_v9 = vld [vmem:[#allocation7 + $0x60] sm:$0xff]  ;;  %v172_v10 = vld [vmem:[#allocation7 + $0x58] sm:$0xff]  ;;  %v171_v11 = vld [vmem:[#allocation7 + $0x50] sm:$0xff]  ;;  %s573_s19 = scalar_lea.vmem %s350_s18, 128  ;;  %p578_p7 = scmp.lt.s32.totalorder %s350_s18, %s350_s18 }
  0x37   :  { %405 = vmatprep.subr.mxu0 %v607_v0  ;;  %416 = vmatprep.subr.mxu1 %v607_v0  ;;  %v170_v12 = vld [vmem:[#allocation7 + $0x48] sm:$0xff]  ;;  %v169_v13 = vld [vmem:[#allocation7 + $0x40] sm:$0xff]  ;;  %v168_v14 = vld [vmem:[#allocation7 + $0x38] sm:$0xff]  ;;  %p574_p6 = scmp.ne.s32.totalorder %s350_s18, %s573_s19  ;;  %p579_p8 = scmp.lt.s32.totalorder %s573_s19, %s573_s19 }
  0x38   :  { %406 = vmatpush3.msra.mxu0 %v80_v2  ;;  %417 = vmatpush3.msra.mxu1 %v175_v5  ;;  %v167_v15 = vld [vmem:[#allocation7 + $0x30] sm:$0xff]  ;;  %v166_v16 = vld [vmem:[#allocation7 + $0x28] sm:$0xff]  ;;  %v165_v17 = vld [vmem:[#allocation7 + $0x20] sm:$0xff] }
  0x39   :  { %407 = vmatprep.subr.mxu0 %v607_v0  ;;  %418 = vmatprep.subr.mxu1 %v607_v0  ;;  %v164_v18 = vld [vmem:[#allocation7 + $0x18] sm:$0xff]  ;;  %v163_v19 = vld [vmem:[#allocation7 + $0x10] sm:$0xff]  ;;  %v162_v20 = vld [vmem:[#allocation7 + $0x8] sm:$0xff]  ;;  %p580_p9 = por %p579_p8, %p578_p7 }
  0x3a   :  { %408 = vmatpush3.msra.mxu0 %v79_v4  ;;  %419 = vmatpush3.msra.mxu1 %v174_v6  ;;  %v161_v21 = vld [vmem:[#allocation7] sm:$0xff]  ;;  %v267_v22 = vld [vmem:[#allocation8 + $0x78] sm:$0xff]  ;;  %v266_v23 = vld [vmem:[#allocation8 + $0x70] sm:$0xff] }
  0x3b   :  { %409 = vmatprep.subr.mxu0 %v607_v0  ;;  %420 = vmatprep.subr.mxu1 %v607_v0  ;;  %v265_v24 = vld [vmem:[#allocation8 + $0x68] sm:$0xff]  ;;  %v264_v25 = vld [vmem:[#allocation8 + $0x60] sm:$0xff]  ;;  %v263_v26 = vld [vmem:[#allocation8 + $0x58] sm:$0xff]  ;;  %p581_p10 = pnand %p580_p9, %p574_p6 }
  0x3c   :  { %410 = vmatpush3.msra.mxu0 %v78_v7  ;;  %421 = vmatpush3.msra.mxu1 %v173_v9  ;;  %v262_v27 = vld [vmem:[#allocation8 + $0x50] sm:$0xff]  ;;  %v261_v28 = vld [vmem:[#allocation8 + $0x48] sm:$0xff]  ;;  %v260_v29 = vld [vmem:[#allocation8 + $0x40] sm:$0xff] }
  0x3d   :  { %412 = vmatmul.mubr.msk.f32.vlgmr.msra.gmra.mxu0 %vm86_vm1, %v74_v8  ;;  %422 = vmatprep.subr.mxu1 %v607_v0  ;;  %v259_v30 = vld [vmem:[#allocation8 + $0x38] sm:$0xff]  ;;  %v258_v31 = vld [vmem:[#allocation8 + $0x30] sm:$0xff]  ;;  %v257_v32 = vld [vmem:[#allocation8 + $0x28] sm:$0xff] }
  0x3e   :  { %449 = vmatprep.subr.mxu0 %v607_v0  ;;  %423 = vmatpush3.msra.mxu1 %v172_v10  ;;  %v256_v33 = vld [vmem:[#allocation8 + $0x20] sm:$0xff]  ;;  %v255_v34 = vld [vmem:[#allocation8 + $0x18] sm:$0xff]  ;;  %v254_v40 = vld [vmem:[#allocation8 + $0x10] sm:$0xff] }
  0x3f   :  { %481 = vmatprep.mubr.msk.f32.mxu0 %vm608_vm0, %v607_v0  ;;  %424 = vmatprep.subr.mxu1 %v607_v0  ;;  %v360_v35 = vld [vmem:[%s719_s4] ss:$0 sm:$0xff]  ;;  %v253_v41 = vld [vmem:[#allocation8 + $0x8] sm:$0xff]  ;;  %v252_v42 = vld [vmem:[#allocation8] sm:$0xff] }
  0x40   :  { %425 = vmatpush3.msra.mxu1 %v171_v11  ;;  %450 = vmatpush3.msra.mxu0 %v267_v22  ;;  %v362_v43 = vld [vmem:[%s719_s4 + $0x1] ss:$0 sm:$0xff]  ;;  %v363_v48 = vld [vmem:[%s719_s4 + $0x2] ss:$0 sm:$0xff] }
  0x41   :  { %426 = vmatprep.subr.mxu1 %v607_v0  ;;  %451 = vmatprep.subr.mxu0 %v607_v0 }
  0x42   :  { %427 = vmatpush3.msra.mxu1 %v170_v12  ;;  %452 = vmatpush3.msra.mxu0 %v266_v23 }
  0x43   :  { %428 = vmatprep.subr.mxu1 %v607_v0  ;;  %453 = vmatprep.subr.mxu0 %v607_v0 }
  0x44   :  { %429 = vmatpush3.msra.mxu1 %v169_v13  ;;  %454 = vmatpush3.msra.mxu0 %v265_v24 }
  0x45   :  { %430 = vmatprep.subr.mxu1 %v607_v0  ;;  %455 = vmatprep.subr.mxu0 %v607_v0 }
  0x46   :  { %431 = vmatpush3.msra.mxu1 %v168_v14  ;;  %456 = vmatpush3.msra.mxu0 %v264_v25 }
  0x47   :  { %432 = vmatprep.subr.mxu1 %v607_v0  ;;  %457 = vmatprep.subr.mxu0 %v607_v0 }
  0x48   :  { %433 = vmatpush3.msra.mxu1 %v167_v15  ;;  %458 = vmatpush3.msra.mxu0 %v263_v26 }
  0x49   :  { %434 = vmatprep.subr.mxu1 %v607_v0  ;;  %459 = vmatprep.subr.mxu0 %v607_v0 }
  0x4a   :  { %435 = vmatpush3.msra.mxu1 %v166_v16  ;;  %460 = vmatpush3.msra.mxu0 %v262_v27 }
  0x4b   :  { %436 = vmatprep.subr.mxu1 %v607_v0  ;;  %461 = vmatprep.subr.mxu0 %v607_v0 }
  0x4c   :  { %437 = vmatpush3.msra.mxu1 %v165_v17  ;;  %462 = vmatpush3.msra.mxu0 %v261_v28 }
  0x4d   :  { %438 = vmatprep.subr.mxu1 %v607_v0  ;;  %463 = vmatprep.subr.mxu0 %v607_v0 }
  0x4e   :  { %439 = vmatpush3.msra.mxu1 %v164_v18  ;;  %464 = vmatpush3.msra.mxu0 %v260_v29 }
  0x4f   :  { %440 = vmatprep.subr.mxu1 %v607_v0  ;;  %465 = vmatprep.subr.mxu0 %v607_v0 }
  0x50   :  { %441 = vmatpush3.msra.mxu1 %v163_v19  ;;  %466 = vmatpush3.msra.mxu0 %v259_v30 }
  0x51   :  { %442 = vmatprep.subr.mxu1 %v607_v0  ;;  %467 = vmatprep.subr.mxu0 %v607_v0 }
  0x52   :  { %443 = vmatpush3.msra.mxu1 %v162_v20  ;;  %468 = vmatpush3.msra.mxu0 %v258_v31 }
  0x53   :  { %444 = vmatprep.subr.mxu1 %v607_v0  ;;  %469 = vmatprep.subr.mxu0 %v607_v0 }
  0x54   :  { %445 = vmatpush3.msra.mxu1 %v161_v21  ;;  %470 = vmatpush3.msra.mxu0 %v257_v32 }
  0x55   :  { %471 = vmatprep.subr.mxu0 %v607_v0 }
  0x56   :  { %472 = vmatpush3.msra.mxu0 %v256_v33 }
  0x57   :  { %473 = vmatprep.subr.mxu0 %v607_v0 }
  0x58   :  { %474 = vmatpush3.msra.mxu0 %v255_v34 }
  0x59   :  { %475 = vmatprep.subr.mxu0 %v607_v0 }
  0x5a   :  { %476 = vmatpush3.msra.mxu0 %v254_v40 }
  0x5b   :  { %477 = vmatprep.subr.mxu0 %v607_v0 }
  0x5c   :  { %478 = vmatpush3.msra.mxu0 %v253_v41 }
  0x5d   :  { %479 = vmatprep.subr.mxu0 %v607_v0 }
  0x5e   :  { %480 = vmatpush3.msra.mxu0 %v252_v42 }
  0xfd   :  { %v156_v36 = vpop.f32.mrf.mxu0 }
  0xfe   :  { %v157_v37 = vadd.f32 %v360_v35, %v156_v36 }
  0xff   :  { %v413_v38 = vpop.f32.mrf.mxu0 }
 0x100   :  { %v160_v39 = vmax.f32 %v157_v37, 0.0 }
 0x102   :  { %447 = vmatmul.mubr.f32.vlgmr.msra.gmra.mxu1 %v160_v39 }
 0x1c2   :  { %v247_v44 = vpop.f32.mrf.mxu1 }
 0x1c3   :  { %v248_v45 = vadd.f32 %v362_v43, %v247_v44 }
 0x1c4   :  { %v448_v46 = vpop.f32.mrf.mxu1 }
 0x1c5   :  { %v251_v47 = vmax.f32 %v248_v45, 0.0 }
 0x1c7   :  { %482 = vmatmul.mubr.f32.vlgmr.msra.gmra.mxu0 %v251_v47 }
 0x287   :  { %v338_v49 = vpop.f32.mrf.mxu0 }
 0x288   :  { %v339_v50 = vadd.f32 %v363_v48, %v338_v49 }
 0x289   :  { %v483_v51 = vpop.f32.mrf.mxu0 }
 0x28a   :  { %342 = vst [vmem:[#allocation10] sm:$0xff] %v339_v50 }
 0x28b   :  { %584 = shalt.err (!%p581_p10)
}
 0x28c   :  { %352 = dma.vmem_to_hbm [thread:$0]  %s350_s18, 128, %s720_s5, [#allocation4]  }
 0x28d   :  { %599 = dma.done.wait [#allocation4], 128  }
 0x28e   :  { %600 = vsyncadd [#allocation4], 4294967168 }
 0x28f   :  { %356 = vsyncpa [#allocation3], 1 }
 0x290   :  { %357 = vsyncpa [#allocation6], 1 }
 0x291   :  { %358 = vsyncpa [#allocation9], 1 }
 0x292   :  { %359 = vsyncpa [#allocation4], 1 }

</bundles_post_ra>
